<compile_context>
chip_gen: v5e
topology: v5e:2x2
jax: 0.10.0
libtpu: 0.0.40
codegen_flags: <defaults>
</compile_context>

<pallas_src>
import functools

import jax
import jax.numpy as jnp
from jax.experimental import pallas as pl
from jax.experimental.pallas import tpu as pltpu


_VMEM_LIMIT_BYTES = 32 * 1024 * 1024
_NEG_INF = -1e30


def _pick_tile(dim, preferred, align):
    """Largest multiple of `align` dividing `dim` that is <= preferred, else full dim."""
    if dim <= preferred:
        return dim
    t = (preferred // align) * align
    while t >= align:
        if dim % t == 0:
            return t
        t -= align
    return dim


# ----------------------------------------------------------------------------
# Tiled linear (x @ w + b) with fp32 accumulator scratch
# ----------------------------------------------------------------------------
def _linear_bias_kernel(x_ref, w_ref, b_ref, o_ref, acc_ref):
    k = pl.program_id(2)

    @pl.when(k == 0)
    def _():
        acc_ref[...] = jnp.zeros_like(acc_ref)

    acc_ref[...] += jnp.dot(x_ref[...], w_ref[...],
                            preferred_element_type=jnp.float32)

    @pl.when(k == pl.num_programs(2) - 1)
    def _():
        o_ref[...] = (acc_ref[...] + b_ref[...].astype(jnp.float32)).astype(o_ref.dtype)


def linear_with_bias(x, w, b, *, tm=256, tn=256, tk=512):
    M, K = x.shape
    Kw, N = w.shape
    assert K == Kw
    tm = _pick_tile(M, tm, 8)
    tn = _pick_tile(N, tn, 128)
    tk = _pick_tile(K, tk, 128)
    b2 = b.reshape(1, N)
    return pl.pallas_call(
        _linear_bias_kernel,
        out_shape=jax.ShapeDtypeStruct((M, N), x.dtype),
        grid=(M // tm, N // tn, K // tk),
        in_specs=[
            pl.BlockSpec((tm, tk), lambda i, j, k: (i, k)),
            pl.BlockSpec((tk, tn), lambda i, j, k: (k, j)),
            pl.BlockSpec((1, tn), lambda i, j, k: (0, j)),
        ],
        out_specs=pl.BlockSpec((tm, tn), lambda i, j, k: (i, j)),
        scratch_shapes=[pltpu.VMEM((tm, tn), jnp.float32)],
        compiler_params=pltpu.CompilerParams(
            dimension_semantics=("parallel", "parallel", "arbitrary"),
            vmem_limit_bytes=_VMEM_LIMIT_BYTES,
        ),
    )(x, w, b2)


# ----------------------------------------------------------------------------
# NeoX partial rotary embedding, applied once per token to the Q/K thirds
# of the fused qkv activation.  rotate_half via pltpu.roll (XLU) + sign-folded
# sin table; non-rotary lanes pass through via cos=1 / sin=0 padding.
# ----------------------------------------------------------------------------
def _rope_kernel(x_ref, cos_ref, sin_ref, o_ref, *, rd2, head_size):
    x = x_ref[...].astype(jnp.float32)                      # (ts, D)
    # partner[:, i] = x[:, i + rd2]  for i <  rd2
    #                 x[:, i - rd2]  for rd2 <= i < rotary_dim
    # (lanes >= rotary_dim are multiplied by sin == 0, value irrelevant)
    fwd = pltpu.roll(x, head_size - rd2, 1)                  # [:, i] = x[:, (i + rd2) % D]
    bwd = pltpu.roll(x, rd2, 1)                              # [:, i] = x[:, (i - rd2) % D]
    lane = jax.lax.broadcasted_iota(jnp.int32, x.shape, 1)
    partner = jnp.where(lane < rd2, fwd, bwd)
    out = x * cos_ref[...] + partner * sin_ref[...]
    o_ref[...] = out.astype(o_ref.dtype)


def apply_neox_rope(qkv, cos_full, sin_full, *, num_heads, head_size,
                    rotary_dim, ts=256):
    S = qkv.shape[0]
    ts = _pick_tile(S, ts, 8)
    rd2 = rotary_dim // 2
    kernel = functools.partial(_rope_kernel, rd2=rd2, head_size=head_size)
    # Only the Q and K thirds (first 2*num_heads head-blocks) are processed.
    return pl.pallas_call(
        kernel,
        out_shape=jax.ShapeDtypeStruct((S, 2 * num_heads * head_size), qkv.dtype),
        grid=(S // ts, 2 * num_heads),
        in_specs=[
            pl.BlockSpec((ts, head_size), lambda si, c: (si, c)),
            pl.BlockSpec((ts, head_size), lambda si, c: (si, 0)),
            pl.BlockSpec((ts, head_size), lambda si, c: (si, 0)),
        ],
        out_specs=pl.BlockSpec((ts, head_size), lambda si, c: (si, c)),
        compiler_params=pltpu.CompilerParams(
            dimension_semantics=("parallel", "parallel"),
            vmem_limit_bytes=_VMEM_LIMIT_BYTES,
        ),
    )(qkv, cos_full, sin_full)


# ----------------------------------------------------------------------------
# Causal flash attention (online softmax, KV tiles skipped above the diagonal)
# ----------------------------------------------------------------------------
def _flash_attn_kernel(q_ref, k_ref, v_ref, o_ref, m_sc, l_sc, acc_sc,
                       *, scale, tq, tkv):
    qi = pl.program_id(1)
    ki = pl.program_id(2)

    @pl.when(ki == 0)
    def _():
        m_sc[...] = jnp.full_like(m_sc, -jnp.inf)
        l_sc[...] = jnp.zeros_like(l_sc)
        acc_sc[...] = jnp.zeros_like(acc_sc)

    # Skip KV tiles that lie entirely above the causal diagonal.
    @pl.when(ki * tkv <= qi * tq + (tq - 1))
    def _():
        q = q_ref[...]                                        # (tq, D), input dtype
        k = k_ref[...]                                        # (tkv, D)
        s = jax.lax.dot_general(
            q, k, (((1,), (1,)), ((), ())),
            preferred_element_type=jnp.float32) * scale       # (tq, tkv) f32
        row = qi * tq + jax.lax.broadcasted_iota(jnp.int32, (tq, tkv), 0)
        col = ki * tkv + jax.lax.broadcasted_iota(jnp.int32, (tq, tkv), 1)
        s = jnp.where(col <= row, s, _NEG_INF)

        m_prev = m_sc[...]
        m_new = jnp.maximum(m_prev, jnp.max(s, axis=-1, keepdims=True))
        alpha = jnp.exp(m_prev - m_new)
        p = jnp.exp(s - m_new)
        l_sc[...] = alpha * l_sc[...] + jnp.sum(p, axis=-1, keepdims=True)
        acc_sc[...] = alpha * acc_sc[...] + jnp.dot(
            p.astype(v_ref.dtype), v_ref[...],
            preferred_element_type=jnp.float32)
        m_sc[...] = m_new

    @pl.when(ki == pl.num_programs(2) - 1)
    def _():
        o_ref[...] = (acc_sc[...] *
                      pl.reciprocal(l_sc[...], approx=True)).astype(o_ref.dtype)


def causal_flash_attention(qk_roped, qkv, *, num_heads, head_size, scale,
                           tq=256, tkv=256):
    S = qkv.shape[0]
    H = num_heads * head_size
    tq = _pick_tile(S, tq, 8)
    tkv = _pick_tile(S, tkv, 8)
    kernel = functools.partial(_flash_attn_kernel, scale=scale, tq=tq, tkv=tkv)
    return pl.pallas_call(
        kernel,
        out_shape=jax.ShapeDtypeStruct((S, H), qkv.dtype),
        grid=(num_heads, S // tq, S // tkv),
        in_specs=[
            # Q of head h: columns [h*D, (h+1)*D) of qk_roped
            pl.BlockSpec((tq, head_size), lambda h, qi, ki: (qi, h)),
            # K of head h: columns [H + h*D, ...) of qk_roped
            pl.BlockSpec((tkv, head_size), lambda h, qi, ki: (ki, num_heads + h)),
            # V of head h: columns [2H + h*D, ...) of the un-roped qkv
            pl.BlockSpec((tkv, head_size), lambda h, qi, ki: (ki, 2 * num_heads + h)),
        ],
        out_specs=pl.BlockSpec((tq, head_size), lambda h, qi, ki: (qi, h)),
        scratch_shapes=[
            pltpu.VMEM((tq, 1), jnp.float32),        # running max m
            pltpu.VMEM((tq, 1), jnp.float32),        # running denom l
            pltpu.VMEM((tq, head_size), jnp.float32)  # un-normalized accumulator
        ],
        compiler_params=pltpu.CompilerParams(
            dimension_semantics=("parallel", "parallel", "arbitrary"),
            vmem_limit_bytes=_VMEM_LIMIT_BYTES,
        ),
    )(qk_roped, qk_roped, qkv)


# ----------------------------------------------------------------------------
# Module wrapper (forward pass of GPTNeoXAttention, prefill path)
# ----------------------------------------------------------------------------
def gpt_neox_attention(position_ids, hidden_states, params, *, num_heads,
                       head_size, rotary_dim, rope_base=10000.0):
    S, H = hidden_states.shape
    assert H == num_heads * head_size
    scale = head_size ** (-0.5)

    # 1) fused QKV projection (ColumnParallelLinear, world_size=1) -> (S, 3H)
    #    NOTE: like the module, qkv is split into contiguous thirds (q|k|v).
    qkv = linear_with_bias(hidden_states, params["w_qkv"], params["b_qkv"])

    # 2) RoPE tables (sign folded into sin; identity/zero padding on the
    #    non-rotary lanes so the rope kernel stays full-lane-width).
    rd2 = rotary_dim // 2
    inv_freq = 1.0 / (rope_base ** (
        jnp.arange(0, rotary_dim, 2, dtype=jnp.float32) / rotary_dim))
    freqs = position_ids.astype(jnp.float32)[:, None] * inv_freq[None, :]  # (S, rd2)
    cos = jnp.cos(freqs)
    sin = jnp.sin(freqs)
    pad = head_size - rotary_dim
    cos_full = jnp.concatenate([cos, cos, jnp.ones((S, pad), jnp.float32)], axis=-1)
    sin_full = jnp.concatenate([-sin, sin, jnp.zeros((S, pad), jnp.float32)], axis=-1)

    qk_roped = apply_neox_rope(
        qkv, cos_full, sin_full,
        num_heads=num_heads, head_size=head_size, rotary_dim=rotary_dim)

    # 3) causal flash attention; output written directly as (S, H)
    attn_out = causal_flash_attention(
        qk_roped, qkv, num_heads=num_heads, head_size=head_size, scale=scale)

    # 4) output projection (RowParallelLinear, world_size=1)
    return linear_with_bias(attn_out, params["w_dense"], params["b_dense"])


# ----------------------------------------------------------------------------
# Pure-JAX reference for sanity checking.
# ----------------------------------------------------------------------------
def _reference(position_ids, hidden_states, params, *, num_heads, head_size,
               rotary_dim, rope_base=10000.0):
    S, H = hidden_states.shape
    qkv = hidden_states @ params["w_qkv"] + params["b_qkv"]
    q, k, v = jnp.split(qkv, 3, axis=-1)
    q = q.reshape(S, num_heads, head_size)
    k = k.reshape(S, num_heads, head_size)
    v = v.reshape(S, num_heads, head_size)

    rd2 = rotary_dim // 2
    inv_freq = 1.0 / (rope_base ** (jnp.arange(0, rotary_dim, 2, dtype=jnp.float32)
                                    / rotary_dim))
    freqs = position_ids.astype(jnp.float32)[:, None] * inv_freq[None, :]
    cos = jnp.concatenate([jnp.cos(freqs)] * 2, axis=-1)[:, None, :]
    sin = jnp.concatenate([jnp.sin(freqs)] * 2, axis=-1)[:, None, :]

    def rope(x):
        x_rot, x_pass = x[..., :rotary_dim], x[..., rotary_dim:]
        x1, x2 = x_rot[..., :rd2], x_rot[..., rd2:]
        rot = jnp.concatenate([-x2, x1], axis=-1)
        return jnp.concatenate([x_rot * cos + rot * sin, x_pass], axis=-1)

    q, k = rope(q), rope(k)
    s = jnp.einsum("qhd,khd->hqk", q, k) * (head_size ** -0.5)
    mask = jnp.tril(jnp.ones((S, S), bool))
    s = jnp.where(mask[None], s, -1e30)
    p = jax.nn.softmax(s, axis=-1)
    o = jnp.einsum("hqk,khd->qhd", p, v).reshape(S, H)
    return o @ params["w_dense"] + params["b_dense"]


if __name__ == "__main__":
    # Small GPTNeoXConfig-like settings (head_size lane-aligned at 128;
    # seq chosen so the flash/linear tiling exercises multiple grid steps).
    hidden_size = 256
    num_heads = 2
    head_size = hidden_size // num_heads          # 128
    rotary_pct = 0.25
    rotary_dim = int(head_size * rotary_pct)      # 32 (even)
    seq_len = 512

    key = jax.random.PRNGKey(0)
    k1, k2, k3, k4, k5 = jax.random.split(key, 5)
    params = {
        "w_qkv": 0.02 * jax.random.normal(k1, (hidden_size, 3 * hidden_size), jnp.float32),
        "b_qkv": 0.02 * jax.random.normal(k2, (3 * hidden_size,), jnp.float32),
        "w_dense": 0.02 * jax.random.normal(k3, (hidden_size, hidden_size), jnp.float32),
        "b_dense": 0.02 * jax.random.normal(k4, (hidden_size,), jnp.float32),
    }
    hidden_states = jax.random.normal(k5, (seq_len, hidden_size), jnp.float32)
    position_ids = jnp.arange(seq_len, dtype=jnp.int32)

    out = gpt_neox_attention(
        position_ids, hidden_states, params,
        num_heads=num_heads, head_size=head_size, rotary_dim=rotary_dim,
    )
    out = jax.block_until_ready(out)

    ref = _reference(
        position_ids, hidden_states, params,
        num_heads=num_heads, head_size=head_size, rotary_dim=rotary_dim,
    )
    assert out.shape == (seq_len, hidden_size)
    assert jnp.allclose(out, ref, atol=2e-2, rtol=2e-2), "mismatch vs reference"

    print("KERNEL_OK")
</pallas_src>

<mosaic_0001>
module attributes {stable_mosaic.version = 11 : i64} {
  func.func @_linear_bias_kernel(%arg0: i32, %arg1: i32, %arg2: i32, %arg3: memref<256x256xf32, #tpu.memory_space<vmem>>, %arg4: memref<256x256xf32, #tpu.memory_space<vmem>>, %arg5: memref<1x256xf32, #tpu.memory_space<vmem>>, %arg6: memref<256x256xf32, #tpu.memory_space<vmem>>, %arg7: memref<256x256xf32, #tpu.memory_space<vmem>>) attributes {dimension_semantics = [#tpu.dimension_semantics<parallel>, #tpu.dimension_semantics<parallel>, #tpu.dimension_semantics<arbitrary>], iteration_bounds = array<i64: 2, 3, 1>, scalar_prefetch = 0 : i64, scratch_operands = 1 : i64, tpu.core_type = #tpu.core_type<tc>, window_params = [{transform_indices = @transform_0, window_bounds = array<i64: 256, 256>}, {transform_indices = @transform_1, window_bounds = array<i64: 256, 256>}, {transform_indices = @transform_2, window_bounds = array<i64: 1, 256>}, {transform_indices = @transform_3, window_bounds = array<i64: 256, 256>}]} {
    %c0_i32 = arith.constant 0 : i32
    %0 = arith.cmpi eq, %arg2, %c0_i32 : i32
    %1 = arith.extui %0 : i1 to i32
    %c0_i32_0 = arith.constant 0 : i32
    %2 = arith.cmpi ne, %1, %c0_i32_0 : i32
    scf.if %2 {
      %cst_10 = arith.constant 0.000000e+00 : f32
      %12 = vector.broadcast %cst_10 : f32 to vector<256x256xf32>
      %c0_11 = arith.constant 0 : index
      %c0_12 = arith.constant 0 : index
      %13 = vector.load %arg7[%c0_11, %c0_12] : memref<256x256xf32, #tpu.memory_space<vmem>>, vector<256x256xf32>
      tpu.vector_store %arg7[%c0_11, %c0_12], %12 {strides = array<i32>} : memref<256x256xf32, #tpu.memory_space<vmem>>, vector<256x256xf32>,
    } else {
    }
    %c0 = arith.constant 0 : index
    %c0_1 = arith.constant 0 : index
    %3 = vector.load %arg7[%c0, %c0_1] : memref<256x256xf32, #tpu.memory_space<vmem>>, vector<256x256xf32>
    %c0_2 = arith.constant 0 : index
    %c0_3 = arith.constant 0 : index
    %4 = vector.load %arg3[%c0_2, %c0_3] : memref<256x256xf32, #tpu.memory_space<vmem>>, vector<256x256xf32>
    %c0_4 = arith.constant 0 : index
    %c0_5 = arith.constant 0 : index
    %5 = vector.load %arg4[%c0_4, %c0_5] : memref<256x256xf32, #tpu.memory_space<vmem>>, vector<256x256xf32>
    %cst = arith.constant dense<0.000000e+00> : vector<256x256xf32>
    %6 = tpu.matmul %4, %5, %cst {dimension_numbers = #tpu.dot_dimension_numbers<[1], [0], [0], [1], [0, 0, 1, 1], [], []>} : vector<256x256xf32>, vector<256x256xf32>, vector<256x256xf32> -> vector<256x256xf32>
    %7 = arith.addf %3, %6 : vector<256x256xf32>
    %c0_6 = arith.constant 0 : index
    %c0_7 = arith.constant 0 : index
    %8 = vector.load %arg7[%c0_6, %c0_7] : memref<256x256xf32, #tpu.memory_space<vmem>>, vector<256x256xf32>
    tpu.vector_store %arg7[%c0_6, %c0_7], %7 {strides = array<i32>} : memref<256x256xf32, #tpu.memory_space<vmem>>, vector<256x256xf32>,
    %c0_i32_8 = arith.constant 0 : i32
    %9 = arith.cmpi eq, %arg2, %c0_i32_8 : i32
    %10 = arith.extui %9 : i1 to i32
    %c0_i32_9 = arith.constant 0 : i32
    %11 = arith.cmpi ne, %10, %c0_i32_9 : i32
    scf.if %11 {
      %c0_10 = arith.constant 0 : index
      %c0_11 = arith.constant 0 : index
      %12 = vector.load %arg7[%c0_10, %c0_11] : memref<256x256xf32, #tpu.memory_space<vmem>>, vector<256x256xf32>
      %c0_12 = arith.constant 0 : index
      %c0_13 = arith.constant 0 : index
      %13 = vector.load %arg5[%c0_12, %c0_13] : memref<1x256xf32, #tpu.memory_space<vmem>>, vector<1x256xf32>
      %14 = vector.broadcast %13 : vector<1x256xf32> to vector<256x256xf32>
      %15 = arith.addf %12, %14 : vector<256x256xf32>
      %c0_14 = arith.constant 0 : index
      %c0_15 = arith.constant 0 : index
      %16 = vector.load %arg6[%c0_14, %c0_15] : memref<256x256xf32, #tpu.memory_space<vmem>>, vector<256x256xf32>
      tpu.vector_store %arg6[%c0_14, %c0_15], %15 {strides = array<i32>} : memref<256x256xf32, #tpu.memory_space<vmem>>, vector<256x256xf32>,
    } else {
    }
    return
  }
  func.func @transform_0(%arg0: i32, %arg1: i32, %arg2: i32) -> (i32, i32) {
    %c0_i32 = arith.constant 0 : i32
    return %arg0, %arg2 : i32, i32
  }
  func.func @transform_1(%arg0: i32, %arg1: i32, %arg2: i32) -> (i32, i32) {
    %c0_i32 = arith.constant 0 : i32
    return %arg2, %arg1 : i32, i32
  }
  func.func @transform_2(%arg0: i32, %arg1: i32, %arg2: i32) -> (i32, i32) {
    %c0_i32 = arith.constant 0 : i32
    %c0_i32_0 = arith.constant 0 : i32
    return %c0_i32, %arg1 : i32, i32
  }
  func.func @transform_3(%arg0: i32, %arg1: i32, %arg2: i32) -> (i32, i32) {
    %c0_i32 = arith.constant 0 : i32
    return %arg0, %arg1 : i32, i32
  }
}

</mosaic_0001>

<bundles_post_ra>
// kernel: tpu_custom_call.1
= control target key start
LH: loop header
LB: loop body
LE: loop exit
PB: predicated region body
PF: predicated region fallthrough
CT: control target
= control target key end

     0   :  { %s2503_s0 = inlined_call_operand.hbm [shape: f32[512,256], index: 0, kind: input, shape index: {}]   ;;  %s2504_s1 = inlined_call_operand.hbm [shape: f32[256,768], index: 1, kind: input, shape index: {}]   ;;  %s2505_s2 = inlined_call_operand.hbm [shape: f32[1,768], index: 2, kind: input, shape index: {}]   ;;  %s2506_s3 = inlined_call_operand.hbm [shape: f32[512,768], index: 3, kind: output, shape index: {}]  }
   0x1   :  { %2518 = sst [smem:[#allocation25_spill]] %s2504_s1 }
   0x2   :  { %2519 = sst [smem:[#allocation26_spill]] %s2506_s3 }
   0x3   :  { %8 = vsyncpa [#allocation4], 0 }
   0x4   :  { %10 = vsyncpa [#allocation4 + $0x1], 0 }
   0x5   :  { %11 = vsyncpa [#allocation7], 0 }
   0x6   :  { %13 = vsyncpa [#allocation7 + $0x1], 0 }
   0x7   :  { %14 = vsyncpa [#allocation5], 0 }
   0x8   :  { %16 = vsyncpa [#allocation5 + $0x1], 0  ;;  %s1945_s12 = smov 0   ;;  %s1947_s13 = smov 0  }
   0x9   :  { %s1949_s14 = smov 0   ;;  %s1951_s15 = smov 0  }
   0xa   :  { %s1953_s16 = smov 0   ;;  %s1955_s17 = smov 0  }
   0xb   :  { %s1957_s18 = smov 0   ;;  %s1959_s19 = smov 0  }
   0xc   :  { %s1961_s20 = smov 0   ;;  %s1963_s21 = smov 0  }
   0xd   :  { %s1965_s22 = smov 0   ;;  %s1967_s23 = smov 0  }
   0xe   :  { %s1969_s24 = smov 0   ;;  %s1971_s25 = smov 0  }
   0xf LB: > { %2520 = sst [smem:[#allocation13_spill]] %s1865_s12  ;;  %s37_s26 = sadd.s32 1, %s1909_s23  ;;  %s1917_s25 = sphi %s1971_s25, %s22_s25   ;;  %s1913_s24 = sphi %s1969_s24, %s2558_s24   ;;  %s1909_s23 = sphi %s1967_s23, %s2567_s23   ;;  %s1905_s22 = sphi %s1965_s22, %s2556_s22   ;;  %s1901_s21 = sphi %s1963_s21, %s2566_s21   ;;  %s1897_s20 = sphi %s1961_s20, %s2555_s20   ;;  %s1893_s19 = sphi %s1959_s19, %s2565_s19   ;;  %s1889_s18 = sphi %s1957_s18, %s2564_s18   ;;  %s1885_s17 = sphi %s1955_s17, %s2563_s17   ;;  %s1881_s16 = sphi %s1953_s16, %s2562_s16   ;;  %s1877_s15 = sphi %s1951_s15, %s2561_s15   ;;  %s1873_s14 = sphi %s1949_s14, %s2552_s14   ;;  %s1869_s13 = sphi %s1947_s13, %s2560_s13   ;;  %s1865_s12 = sphi %s1945_s12, %s2559_s12  }
  0x10   : > { %2521 = sst [smem:[#allocation14_spill]] %s1873_s14  ;;  %p58_p0 = scmp.eq.s32.totalorder %s1917_s25, 0 }
  0x11   : > { %2522 = sst [smem:[#allocation15_spill]] %s1897_s20  ;;  %p2019_p1 = scmp.ge.s32.totalorder %s37_s26, 3 }
  0x12   : > { %2523 = sst [smem:[#allocation16_spill]] %s1901_s21  ;;  %p85_p2 = scmp.ne.s32.totalorder %s1885_s17, %s1881_s16 }
  0x13   : > { %2524 = sst [smem:[#allocation17_spill]] %s1905_s22  ;;  %p91_p3 = scmp.ne.s32.totalorder %s1881_s16, %s1877_s15 }
  0x14   : > { %2525 = sst [smem:[#allocation18_spill]] %s1913_s24  ;;  %p1557_p4 = scmp.lt.s32.totalorder %s1917_s25, 6 }
  0x15   : > { %p87_p5 = por %p85_p2, %p58_p0  ;;  %s194_s29 = sand.u32 1, %s1917_s25  }
  0x16   : > { %s2507_s30 = sand.u32 1, %s1885_s17   ;;  %s1533_s5 = sshll.u32 %s1909_s23, 4 }
  0x17   : > { %s1514_s4 = sshll.u32 %s2507_s30, 9  ;;  %s2527_s1 = sld [smem:[#allocation25_spill]] }
  0x18   : > { %s198_s10 = scalar_lea.vmem [#allocation6], %s1514_s4  ;;  %p2041_p6 = pnand %p1557_p4, %p87_p5 }
  0x19   : > { %s209_s11 = sshll.u32 %s198_s10, 4  ;;  %p1519_p7 = scmp.ge.s32.totalorder %s1917_s25, 1  ;;  %s210_s11 = int_to_ptr.vmem [resolvable:$true] %s209_s11 }
  0x1a   : > { %p236_p8 = scmp.lt.s32.totalorder %s1917_s25, 7  ;;  %s2047_s4 = scalar_lea.sflag [#allocation7], %s194_s29 }
  0x1b   : > { %s2508_s6 = smov 256   ;;  %s2509_s7 = smov 16  }
  0x1c   : > { %p2054_p9 = pnand %p1519_p7, %p236_p8  ;;  %s2059_s10 = sadd.s32 4294967295, %s1917_s25  }
  0x1d   : > { %s206_s8 = scalar_lea.hbm %s2527_s1, %s1533_s5  ;;  %s1919_s5 = smov 768  }
  0x1e   : > { %s207_s9 = sshll.u32 %s206_s8, 4  ;;  %s1507_s29 = sadd.s32 4294967294, %s1917_s25   ;;  %s208_s9 = int_to_ptr.hbm [resolvable:$true] %s207_s9 }
  0x1f   : > { %1549 = dma.hbm_to_vmem [thread:$0]  (!%p2041_p6), %s208_s9, 8192, %s210_s11, %s2047_s4, %s1919_s5, %s2508_s6, %s2509_s7  }
  0x20   : > { %s2569_s26 = smov (%p2019_p1, %s37_s26), 0  ;;  %s41_s28 = sadd.s32 1, %s1913_s24 }
  0x21   : > { %2530 = sst [smem:[#allocation19_spill]] %s2569_s26  ;;  %s50_s9 = sadd.s32 1, %s1897_s20 }
  0x22   : > { %s2571_s28 = smov (!%p2019_p1, %s41_s28), %s1913_s24  ;;  %p57_p10 = scmp.ne.s32.totalorder %s1897_s20, %s1893_s19 }
  0x23   : > { %p63_p11 = scmp.ne.s32.totalorder %s1893_s19, %s1889_s18  ;;  %p43_p12 = scmp.ge.s32.totalorder %s2571_s28, 2 }
  0x24   : > { %p64_p13 = scmp.eq.s32.totalorder %s2059_s10, 0  ;;  %p2080_p2 = por %p58_p0, %p57_p10 }
  0x25   : > { %s74_s5 = ssub.s32 %s1909_s23, %s2569_s26  ;;  %s2573_s28 = smov (%p43_p12, %s2571_s28), 0 }
  0x26   : > { %2532 = sst [smem:[#allocation20_spill]] %s2573_s28  ;;  %p2088_p1 = por %p64_p13, %p63_p11 }
  0x27   : > { %p76_p5 = scmp.eq.s32.totalorder %s74_s5, 0  ;;  %s45_s18 = ssub.s32 %s1913_s24, %s2573_s28 }
  0x28   : > { %p2097_p7 = por %p91_p3, %p64_p13  ;;  %p48_p0 = scmp.eq.s32.totalorder %s45_s18, 0 }
  0x29   : > { %s129_s7 = sor.u32 %s74_s5, %s45_s18  ;;  %s2535_s1 = sadd.s32 1, %s1885_s17 }
  0x2a   : > { %s2104_s26 = scalar_select %p76_p5, %s1885_s17, %s2535_s1  }
  0x2b   : > { %s2107_s3 = scalar_select %p48_p0, %s1897_s20, %s50_s9  }
  0x2c   : > { %2536 = sst [smem:[#allocation21_spill]] %s2104_s26  ;;  %p130_p8 = scmp.eq.s32.totalorder %s129_s7, 0 }
  0x2d   : > { %2537 = sst [smem:[#allocation22_spill]] %s2107_s3  ;;  %s132_s21 = sadd.s32 1, %s1873_s14 }
  0x2e   : > { %p142_p10 = scmp.ne.s32.totalorder %s1873_s14, %s1869_s13  ;;  %p143_p11 = scmp.eq.s32.totalorder %s2059_s10, 5 }
  0x2f   : > { %s2114_s15 = scalar_select %p130_p8, %s1873_s14, %s132_s21  }
  0x30   : > { %p2116_p3 = por %p143_p11, %p142_p10  ;;  %p148_p12 = scmp.ne.s32.totalorder %s1869_s13, %s1865_s12 }
  0x31   : > { %2538 = sst [smem:[#allocation23_spill]] %s2114_s15  ;;  %p149_p13 = scmp.eq.s32.totalorder %s1507_s29, 5 }
  0x32   : > { %s169_s1 = sand.u32 1, %s1897_s20   ;;  %s1532_s7 = sshll.u32 %s1913_s24, 9 }
  0x33   : > { %s1510_s5 = sshll.u32 %s169_s1, 9  ;;  %p2123_p5 = por %p149_p13, %p148_p12 }
  0x34   : > { %s173_s18 = scalar_lea.vmem [#allocation3], %s1510_s5  ;;  %s181_s21 = scalar_lea.hbm %s2503_s0, %s1532_s7 }
  0x35   : > { %s2540_s9 = scalar_select %p2123_p5, 1, 0 }
  0x36   : > { %s184_s3 = sshll.u32 %s173_s18, 4  ;;  %s182_s15 = sshll.u32 %s181_s21, 4  ;;  %s185_s3 = int_to_ptr.vmem [resolvable:$true] %s184_s3  ;;  %s183_s15 = int_to_ptr.hbm [resolvable:$true] %s182_s15 }
  0x37   : > { %2541 = sst [smem:[#allocation24_spill]] %s2540_s9  ;;  %p1544_p0 = pnand %p1557_p4, %p2080_p2 }
  0x38   : > { %s2542_s29 = sand.u32 1, %s1885_s17   ;;  %s170_s14 = scalar_lea.sflag [#allocation4], %s169_s1 }
  0x39   : > { %s1517_s20 = sshll.u32 %s2542_s29, 1  ;;  %s2543_s12 = smov 16  }
  0x3a   : > { %s2544_s9 = smov 256   ;;  %s1518_s5 = sshll.u32 %s1909_s23, 1 }
  0x3b   : > { %1546 = dma.hbm_to_vmem [thread:$0]  (!%p1544_p0), %s183_s15, 8192, %s185_s3, %s170_s14, %s2544_s9, %s2544_s9, %s2543_s12  }
  0x3c   : > { %s223_s18 = scalar_lea.vmem [#allocation8], %s1517_s20  ;;  %s227_s7 = scalar_lea.hbm %s2505_s2, %s1518_s5 }
  0x3d   : > { %s231_s24 = sshll.u32 %s223_s18, 4  ;;  %s229_s21 = sshll.u32 %s227_s7, 4  ;;  %s232_s24 = int_to_ptr.vmem [resolvable:$true] %s231_s24  ;;  %s230_s21 = int_to_ptr.hbm [resolvable:$true] %s229_s21 }
  0x3e   : > { %1552 = dma.hbm_to_vmem [thread:$0]  (!%p2041_p6), %s230_s21, 32, %s232_s24, %s2047_s4  }
  0x3f   : > { %240 = sbr.rel (%p2054_p9) target bundleno = 495 (0x1ef), region = 32  ;;  %s242_s11 = sand.u32 (!%p2054_p9), 1, %s1893_s19  }
  0x40   : > { %s1520_s1 = sshll.u32 (!%p2054_p9), %s242_s11, 9  ;;  %s243_s3 = scalar_lea.sflag (!%p2054_p9), [#allocation4], %s242_s11 }
  0x41   : > { %s2150_s12 = scalar_lea.vmem (!%p2054_p9), [#allocation3], %s1520_s1 }
  0x44   : > { %1852 = dma.done.wait (%p2088_p1), %s243_s3, 8192  }
  0x45   : > { %1854 = vsyncadd (%p2088_p1), %s243_s3, 4294959104  ;;  %s252_s14 = sand.u32 1, %s2059_s10   ;;  %s254_s20 = sand.u32 1, %s1881_s16  }
  0x46   : > { %s1521_s24 = sshll.u32 %s254_s20, 9  ;;  %s253_s30 = scalar_lea.sflag [#allocation7], %s252_s14 }
  0x47   : > { %s2160_s4 = scalar_lea.vmem [#allocation6], %s1521_s24 }
  0x48   : > { %1856 = dma.done.wait (%p2097_p7), %s253_s30, 8224  }
  0x49   : > { %1858 = vsyncadd (%p2097_p7), %s253_s30, 4294959072  ;;  %v534_v0 = vld [vmem:[%s2160_s4 + $0xf8] sm:$0xff]  ;;  %v532_v2 = vld [vmem:[%s2160_s4 + $0xe8] sm:$0xff]  ;;  %s1522_s6 = sshll.u32 %s254_s20, 1  ;;  %s297_s8 = sand.u32 1, %s1869_s13  }
  0x4a   : > { %v566_v1 = vld [vmem:[%s2160_s4 + $0x1f8] sm:$0xff]  ;;  %793 = vmatpush.msra.mxu2 %v534_v0  ;;  %v564_v3 = vld [vmem:[%s2160_s4 + $0x1e8] sm:$0xff]  ;;  %v533_v6 = vld [vmem:[%s2160_s4 + $0xf0] sm:$0xff]  ;;  %s266_s10 = scalar_lea.vmem [#allocation8], %s1522_s6  ;;  %s1523_s27 = sshll.u32 %s297_s8, 9 }
  0x4b   : > { %906 = vmatpush.msra.mxu3 %v566_v1  ;;  %v530_v4 = vld [vmem:[%s2160_s4 + $0xd8] sm:$0xff]  ;;  %v565_v7 = vld [vmem:[%s2160_s4 + $0x1f0] sm:$0xff]  ;;  %v531_v8 = vld [vmem:[%s2160_s4 + $0xe0] sm:$0xff]  ;;  %567 = vmatpush.msra.mxu0 %v533_v6  ;;  %s2276_s15 = scalar_lea.vmem [#allocation9], %s1523_s27  ;;  %s2545_s9 = sld [smem:[#allocation17_spill]] }
  0x4c   : > { %v562_v5 = vld [vmem:[%s2160_s4 + $0x1d8] sm:$0xff]  ;;  %794 = vmatpush.msra.mxu2 %v532_v2  ;;  %v563_v9 = vld [vmem:[%s2160_s4 + $0x1e0] sm:$0xff]  ;;  %680 = vmatpush.msra.mxu1 %v565_v7  ;;  %v528_v10 = vld [vmem:[%s2160_s4 + $0xc8] sm:$0xff]  ;;  %s2546_s29 = sld [smem:[#allocation16_spill]]  ;;  %s1364_s3 = sshll.u32 %s2276_s15, 4  ;;  %s1365_s3 = int_to_ptr.vmem [resolvable:$true] %s1364_s3 }
  0x4d   : > { %907 = vmatpush.msra.mxu3 %v564_v3  ;;  %v560_v11 = vld [vmem:[%s2160_s4 + $0x1c8] sm:$0xff]  ;;  %v529_v12 = vld [vmem:[%s2160_s4 + $0xd0] sm:$0xff]  ;;  %568 = vmatpush.msra.mxu0 %v531_v8  ;;  %v526_v14 = vld [vmem:[%s2160_s4 + $0xb8] sm:$0xff]  ;;  %s2547_s11 = sld [smem:[#allocation26_spill]]  ;;  %s1349_s14 = scalar_lea.sflag [#allocation5], %s297_s8 }
  0x4e   : > { %795 = vmatpush.msra.mxu2 %v530_v4  ;;  %v561_v13 = vld [vmem:[%s2160_s4 + $0x1d0] sm:$0xff]  ;;  %681 = vmatpush.msra.mxu1 %v563_v9  ;;  %v558_v15 = vld [vmem:[%s2160_s4 + $0x1b8] sm:$0xff]  ;;  %v527_v16 = vld [vmem:[%s2160_s4 + $0xc0] sm:$0xff] }
  0x4f   : > { %908 = vmatpush.msra.mxu3 %v562_v5  ;;  %v559_v17 = vld [vmem:[%s2160_s4 + $0x1c0] sm:$0xff]  ;;  %569 = vmatpush.msra.mxu0 %v529_v12  ;;  %v524_v18 = vld [vmem:[%s2160_s4 + $0xa8] sm:$0xff]  ;;  %v525_v20 = vld [vmem:[%s2160_s4 + $0xb0] sm:$0xff] }
  0x50   : > { %796 = vmatpush.msra.mxu2 %v528_v10  ;;  %682 = vmatpush.msra.mxu1 %v561_v13  ;;  %v556_v19 = vld [vmem:[%s2160_s4 + $0x1a8] sm:$0xff]  ;;  %v557_v21 = vld [vmem:[%s2160_s4 + $0x1b0] sm:$0xff]  ;;  %v522_v22 = vld [vmem:[%s2160_s4 + $0x98] sm:$0xff] }
  0x51   : > { %909 = vmatpush.msra.mxu3 %v560_v11  ;;  %570 = vmatpush.msra.mxu0 %v527_v16  ;;  %v554_v23 = vld [vmem:[%s2160_s4 + $0x198] sm:$0xff]  ;;  %v523_v24 = vld [vmem:[%s2160_s4 + $0xa0] sm:$0xff]  ;;  %v520_v26 = vld [vmem:[%s2160_s4 + $0x88] sm:$0xff]  ;;  %s1534_s5 = smul.u32 192, %s2545_s9 }
  0x52   : > { %797 = vmatpush.msra.mxu2 %v526_v14  ;;  %683 = vmatpush.msra.mxu1 %v559_v17  ;;  %v555_v25 = vld [vmem:[%s2160_s4 + $0x1a0] sm:$0xff]  ;;  %v552_v27 = vld [vmem:[%s2160_s4 + $0x188] sm:$0xff]  ;;  %v521_v28 = vld [vmem:[%s2160_s4 + $0x90] sm:$0xff]  ;;  %s1526_s18 = sshll.u32 %s2546_s29, 1 }
  0x53   : > { %910 = vmatpush.msra.mxu3 %v558_v15  ;;  %571 = vmatpush.msra.mxu0 %v525_v20  ;;  %v553_v29 = vld [vmem:[%s2160_s4 + $0x190] sm:$0xff]  ;;  %v518_v30 = vld [vmem:[%s2160_s4 + $0x78] sm:$0xff]  ;;  %v519_v32 = vld [vmem:[%s2160_s4 + $0x80] sm:$0xff]  ;;  %s1361_s22 = sadd.s32 %s1534_s5, %s1526_s18  ;;  %s1787_s6 = scalar_lea.hbm %s2547_s11, 3072 }
  0x54   : > { %798 = vmatpush.msra.mxu2 %v524_v18  ;;  %684 = vmatpush.msra.mxu1 %v557_v21  ;;  %v550_v31 = vld [vmem:[%s2160_s4 + $0x178] sm:$0xff]  ;;  %v551_v33 = vld [vmem:[%s2160_s4 + $0x180] sm:$0xff]  ;;  %v516_v34 = vld [vmem:[%s2160_s4 + $0x68] sm:$0xff]  ;;  %s1528_s26 = sshll.u32 %s1361_s22, 3 }
  0x55   : > { %911 = vmatpush.msra.mxu3 %v556_v19  ;;  %572 = vmatpush.msra.mxu0 %v523_v24  ;;  %v548_v35 = vld [vmem:[%s2160_s4 + $0x168] sm:$0xff]  ;;  %v517_v36 = vld [vmem:[%s2160_s4 + $0x70] sm:$0xff]  ;;  %v514_v38 = vld [vmem:[%s2160_s4 + $0x58] sm:$0xff]  ;;  %s1363_s1 = scalar_lea.hbm %s2547_s11, %s1528_s26 }
  0x56   : > { %799 = vmatpush.msra.mxu2 %v522_v22  ;;  %685 = vmatpush.msra.mxu1 %v555_v25  ;;  %v549_v37 = vld [vmem:[%s2160_s4 + $0x170] sm:$0xff]  ;;  %v546_v39 = vld [vmem:[%s2160_s4 + $0x158] sm:$0xff]  ;;  %v515_v40 = vld [vmem:[%s2160_s4 + $0x60] sm:$0xff] }
  0x57   : > { %912 = vmatpush.msra.mxu3 %v554_v23  ;;  %573 = vmatpush.msra.mxu0 %v521_v28  ;;  %v547_v41 = vld [vmem:[%s2160_s4 + $0x160] sm:$0xff]  ;;  %v512_v42 = vld [vmem:[%s2160_s4 + $0x48] sm:$0xff]  ;;  %v513_v44 = vld [vmem:[%s2160_s4 + $0x50] sm:$0xff] }
  0x58   : > { %800 = vmatpush.msra.mxu2 %v520_v26  ;;  %686 = vmatpush.msra.mxu1 %v553_v29  ;;  %v544_v43 = vld [vmem:[%s2160_s4 + $0x148] sm:$0xff]  ;;  %v545_v45 = vld [vmem:[%s2160_s4 + $0x150] sm:$0xff]  ;;  %v510_v46 = vld [vmem:[%s2160_s4 + $0x38] sm:$0xff] }
  0x59   : > { %913 = vmatpush.msra.mxu3 %v552_v27  ;;  %574 = vmatpush.msra.mxu0 %v519_v32  ;;  %v542_v47 = vld [vmem:[%s2160_s4 + $0x138] sm:$0xff]  ;;  %v511_v48 = vld [vmem:[%s2160_s4 + $0x40] sm:$0xff]  ;;  %v508_v50 = vld [vmem:[%s2160_s4 + $0x28] sm:$0xff] }
  0x5a   : > { %801 = vmatpush.msra.mxu2 %v518_v30  ;;  %687 = vmatpush.msra.mxu1 %v551_v33  ;;  %v543_v49 = vld [vmem:[%s2160_s4 + $0x140] sm:$0xff]  ;;  %v540_v51 = vld [vmem:[%s2160_s4 + $0x128] sm:$0xff]  ;;  %v509_v52 = vld [vmem:[%s2160_s4 + $0x30] sm:$0xff] }
  0x5b   : > { %914 = vmatpush.msra.mxu3 %v550_v31  ;;  %575 = vmatpush.msra.mxu0 %v517_v36  ;;  %v541_v53 = vld [vmem:[%s2160_s4 + $0x130] sm:$0xff]  ;;  %v506_v54 = vld [vmem:[%s2160_s4 + $0x18] sm:$0xff]  ;;  %v507_v56 = vld [vmem:[%s2160_s4 + $0x20] sm:$0xff] }
  0x5c   : > { %802 = vmatpush.msra.mxu2 %v516_v34  ;;  %688 = vmatpush.msra.mxu1 %v549_v37  ;;  %v538_v55 = vld [vmem:[%s2160_s4 + $0x118] sm:$0xff]  ;;  %v539_v57 = vld [vmem:[%s2160_s4 + $0x120] sm:$0xff]  ;;  %v504_v58 = vld [vmem:[%s2160_s4 + $0x8] sm:$0xff] }
  0x5d   : > { %915 = vmatpush.msra.mxu3 %v548_v35  ;;  %576 = vmatpush.msra.mxu0 %v515_v40  ;;  %v536_v59 = vld [vmem:[%s2160_s4 + $0x108] sm:$0xff]  ;;  %v439_v60 = vld [vmem:[%s2150_s12] sm:$0xff]  ;;  %v505_v62 = vld [vmem:[%s2160_s4 + $0x10] sm:$0xff] }
  0x5e   : > { %803 = vmatpush.msra.mxu2 %v514_v38  ;;  %689 = vmatpush.msra.mxu1 %v547_v41  ;;  %v440_v61 = vld [vmem:[%s2150_s12 + $0x8] sm:$0xff]  ;;  %v537_v63 = vld [vmem:[%s2160_s4 + $0x110] sm:$0xff]  ;;  %v503_v0 = vld [vmem:[%s2160_s4] sm:$0xff] }
  0x5f   : > { %916 = vmatpush.msra.mxu3 %v546_v39  ;;  %577 = vmatpush.msra.mxu0 %v513_v44  ;;  %v535_v1 = vld [vmem:[%s2160_s4 + $0x100] sm:$0xff]  ;;  %v441_v2 = vld [vmem:[%s2150_s12 + $0x10] sm:$0xff]  ;;  %v442_v3 = vld [vmem:[%s2150_s12 + $0x18] sm:$0xff] }
  0x60   : > { %804 = vmatpush.msra.mxu2 %v512_v42  ;;  %690 = vmatpush.msra.mxu1 %v545_v45  ;;  %v443_v4 = vld [vmem:[%s2150_s12 + $0x20] sm:$0xff]  ;;  %v444_v5 = vld [vmem:[%s2150_s12 + $0x28] sm:$0xff]  ;;  %v445_v6 = vld [vmem:[%s2150_s12 + $0x30] sm:$0xff] }
  0x61   : > { %917 = vmatpush.msra.mxu3 %v544_v43  ;;  %578 = vmatpush.msra.mxu0 %v511_v48  ;;  %v446_v7 = vld [vmem:[%s2150_s12 + $0x38] sm:$0xff]  ;;  %v447_v8 = vld [vmem:[%s2150_s12 + $0x40] sm:$0xff]  ;;  %v448_v9 = vld [vmem:[%s2150_s12 + $0x48] sm:$0xff] }
  0x62   : > { %805 = vmatpush.msra.mxu2 %v510_v46  ;;  %691 = vmatpush.msra.mxu1 %v543_v49  ;;  %v449_v10 = vld [vmem:[%s2150_s12 + $0x50] sm:$0xff]  ;;  %v450_v11 = vld [vmem:[%s2150_s12 + $0x58] sm:$0xff]  ;;  %v451_v12 = vld [vmem:[%s2150_s12 + $0x60] sm:$0xff] }
  0x63   : > { %918 = vmatpush.msra.mxu3 %v542_v47  ;;  %579 = vmatpush.msra.mxu0 %v509_v52  ;;  %v452_v13 = vld [vmem:[%s2150_s12 + $0x68] sm:$0xff]  ;;  %v453_v14 = vld [vmem:[%s2150_s12 + $0x70] sm:$0xff]  ;;  %v454_v15 = vld [vmem:[%s2150_s12 + $0x78] sm:$0xff] }
  0x64   : > { %806 = vmatpush.msra.mxu2 %v508_v50  ;;  %692 = vmatpush.msra.mxu1 %v541_v53  ;;  %v455_v16 = vld [vmem:[%s2150_s12 + $0x80] sm:$0xff]  ;;  %v456_v17 = vld [vmem:[%s2150_s12 + $0x88] sm:$0xff]  ;;  %v457_v18 = vld [vmem:[%s2150_s12 + $0x90] sm:$0xff] }
  0x65   : > { %919 = vmatpush.msra.mxu3 %v540_v51  ;;  %580 = vmatpush.msra.mxu0 %v507_v56  ;;  %v458_v19 = vld [vmem:[%s2150_s12 + $0x98] sm:$0xff]  ;;  %v459_v20 = vld [vmem:[%s2150_s12 + $0xa0] sm:$0xff]  ;;  %v460_v21 = vld [vmem:[%s2150_s12 + $0xa8] sm:$0xff] }
  0x66   : > { %807 = vmatpush.msra.mxu2 %v506_v54  ;;  %693 = vmatpush.msra.mxu1 %v539_v57  ;;  %v461_v22 = vld [vmem:[%s2150_s12 + $0xb0] sm:$0xff]  ;;  %v462_v23 = vld [vmem:[%s2150_s12 + $0xb8] sm:$0xff]  ;;  %v463_v24 = vld [vmem:[%s2150_s12 + $0xc0] sm:$0xff] }
  0x67   : > { %920 = vmatpush.msra.mxu3 %v538_v55  ;;  %581 = vmatpush.msra.mxu0 %v505_v62  ;;  %v464_v25 = vld [vmem:[%s2150_s12 + $0xc8] sm:$0xff]  ;;  %v465_v26 = vld [vmem:[%s2150_s12 + $0xd0] sm:$0xff]  ;;  %v466_v27 = vld [vmem:[%s2150_s12 + $0xd8] sm:$0xff] }
  0x68   : > { %808 = vmatpush.msra.mxu2 %v504_v58  ;;  %694 = vmatpush.msra.mxu1 %v537_v63  ;;  %v467_v28 = vld [vmem:[%s2150_s12 + $0xe0] sm:$0xff]  ;;  %v468_v29 = vld [vmem:[%s2150_s12 + $0xe8] sm:$0xff]  ;;  %v469_v30 = vld [vmem:[%s2150_s12 + $0xf0] sm:$0xff] }
  0x69   : > { %921 = vmatpush.msra.mxu3 %v536_v59  ;;  %809 = vmatmul.f32.vlgmr.msra.gmra.mxu2 %v439_v60  ;;  %v470_v31 = vld [vmem:[%s2150_s12 + $0xf8] sm:$0xff]  ;;  %v471_v32 = vld [vmem:[%s2150_s12 + $0x100] sm:$0xff]  ;;  %v472_v33 = vld [vmem:[%s2150_s12 + $0x108] sm:$0xff] }
  0x6a   : > { %922 = vmatmul.f32.vlgmr.msra.gmra.mxu3 %v440_v61  ;;  %582 = vmatpush.msra.mxu0 %v503_v0  ;;  %v1214_v34 = vld [vmem:[%s266_s10] sm:$0x3]  ;;  %v473_v44 = vld [vmem:[%s2150_s12 + $0x110] sm:$0xff]  ;;  %v474_v45 = vld [vmem:[%s2150_s12 + $0x118] sm:$0xff] }
  0x6b   : > { %695 = vmatpush.msra.mxu1 %v535_v1  ;;  %583 = vmatmul.f32.vlgmr.msra.gmra.mxu0 %v439_v60  ;;  %v2269_v35 = vperm.slane %v1214_v34, 0  ;;  %v2271_v39 = vperm.slane %v1214_v34, 1  ;;  %v475_v54 = vld [vmem:[%s2150_s12 + $0x120] sm:$0xff]  ;;  %v476_v55 = vld [vmem:[%s2150_s12 + $0x128] sm:$0xff]  ;;  %v477_v0 = vld [vmem:[%s2150_s12 + $0x130] sm:$0xff] }
  0x6c   : > { %696 = vmatmul.f32.vlgmr.msra.gmra.mxu1 %v440_v61  ;;  %v478_v1 = vld [vmem:[%s2150_s12 + $0x138] sm:$0xff] }
  0x71   : > { %812 = vmatmul.f32.gmra.mxu2 %v441_v2 }
  0x72   : > { %925 = vmatmul.f32.gmra.mxu3 %v442_v3 }
  0x73   : > { %586 = vmatmul.f32.gmra.mxu0 %v441_v2 }
  0x74   : > { %699 = vmatmul.f32.gmra.mxu1 %v442_v3 }
  0x79   : > { %815 = vmatmul.f32.gmra.mxu2 %v443_v4 }
  0x7a   : > { %928 = vmatmul.f32.gmra.mxu3 %v444_v5 }
  0x7b   : > { %589 = vmatmul.f32.gmra.mxu0 %v443_v4 }
  0x7c   : > { %702 = vmatmul.f32.gmra.mxu1 %v444_v5 }
  0x81   : > { %818 = vmatmul.f32.gmra.mxu2 %v445_v6 }
  0x82   : > { %931 = vmatmul.f32.gmra.mxu3 %v446_v7 }
  0x83   : > { %592 = vmatmul.f32.gmra.mxu0 %v445_v6 }
  0x84   : > { %705 = vmatmul.f32.gmra.mxu1 %v446_v7 }
  0x89   : > { %821 = vmatmul.f32.gmra.mxu2 %v447_v8 }
  0x8a   : > { %934 = vmatmul.f32.gmra.mxu3 %v448_v9 }
  0x8b   : > { %595 = vmatmul.f32.gmra.mxu0 %v447_v8 }
  0x8c   : > { %708 = vmatmul.f32.gmra.mxu1 %v448_v9 }
  0x91   : > { %824 = vmatmul.f32.gmra.mxu2 %v449_v10 }
  0x92   : > { %937 = vmatmul.f32.gmra.mxu3 %v450_v11 }
  0x93   : > { %598 = vmatmul.f32.gmra.mxu0 %v449_v10  ;;  %v479_v10 = vld [vmem:[%s2150_s12 + $0x140] sm:$0xff] }
  0x94   : > { %711 = vmatmul.f32.gmra.mxu1 %v450_v11  ;;  %v480_v11 = vld [vmem:[%s2150_s12 + $0x148] sm:$0xff] }
  0x99   : > { %827 = vmatmul.f32.gmra.mxu2 %v451_v12 }
  0x9a   : > { %940 = vmatmul.f32.gmra.mxu3 %v452_v13 }
  0x9b   : > { %601 = vmatmul.f32.gmra.mxu0 %v451_v12 }
  0x9c   : > { %714 = vmatmul.f32.gmra.mxu1 %v452_v13 }
  0xa1   : > { %830 = vmatmul.f32.gmra.mxu2 %v453_v14 }
  0xa2   : > { %943 = vmatmul.f32.gmra.mxu3 %v454_v15 }
  0xa3   : > { %604 = vmatmul.f32.gmra.mxu0 %v453_v14 }
  0xa4   : > { %717 = vmatmul.f32.gmra.mxu1 %v454_v15 }
  0xa9   : > { %833 = vmatmul.f32.gmra.mxu2 %v455_v16 }
  0xaa   : > { %946 = vmatmul.f32.gmra.mxu3 %v456_v17 }
  0xab   : > { %607 = vmatmul.f32.gmra.mxu0 %v455_v16 }
  0xac   : > { %720 = vmatmul.f32.gmra.mxu1 %v456_v17 }
  0xb1   : > { %836 = vmatmul.f32.gmra.mxu2 %v457_v18 }
  0xb2   : > { %949 = vmatmul.f32.gmra.mxu3 %v458_v19 }
  0xb3   : > { %610 = vmatmul.f32.gmra.mxu0 %v457_v18 }
  0xb4   : > { %723 = vmatmul.f32.gmra.mxu1 %v458_v19 }
  0xb9   : > { %839 = vmatmul.f32.gmra.mxu2 %v459_v20 }
  0xba   : > { %952 = vmatmul.f32.gmra.mxu3 %v460_v21 }
  0xbb   : > { %613 = vmatmul.f32.gmra.mxu0 %v459_v20  ;;  %v481_v20 = vld [vmem:[%s2150_s12 + $0x150] sm:$0xff] }
  0xbc   : > { %726 = vmatmul.f32.gmra.mxu1 %v460_v21  ;;  %v482_v21 = vld [vmem:[%s2150_s12 + $0x158] sm:$0xff] }
  0xc1   : > { %842 = vmatmul.f32.gmra.mxu2 %v461_v22 }
  0xc2   : > { %955 = vmatmul.f32.gmra.mxu3 %v462_v23 }
  0xc3   : > { %616 = vmatmul.f32.gmra.mxu0 %v461_v22 }
  0xc4   : > { %729 = vmatmul.f32.gmra.mxu1 %v462_v23 }
  0xc9   : > { %845 = vmatmul.f32.gmra.mxu2 %v463_v24 }
  0xca   : > { %958 = vmatmul.f32.gmra.mxu3 %v464_v25 }
  0xcb   : > { %619 = vmatmul.f32.gmra.mxu0 %v463_v24 }
  0xcc   : > { %732 = vmatmul.f32.gmra.mxu1 %v464_v25 }
  0xd1   : > { %848 = vmatmul.f32.gmra.mxu2 %v465_v26 }
  0xd2   : > { %961 = vmatmul.f32.gmra.mxu3 %v466_v27 }
  0xd3   : > { %622 = vmatmul.f32.gmra.mxu0 %v465_v26 }
  0xd4   : > { %735 = vmatmul.f32.gmra.mxu1 %v466_v27 }
  0xd9   : > { %851 = vmatmul.f32.gmra.mxu2 %v467_v28 }
  0xda   : > { %964 = vmatmul.f32.gmra.mxu3 %v468_v29 }
  0xdb   : > { %625 = vmatmul.f32.gmra.mxu0 %v467_v28 }
  0xdc   : > { %738 = vmatmul.f32.gmra.mxu1 %v468_v29 }
  0xe1   : > { %854 = vmatmul.f32.gmra.mxu2 %v469_v30 }
  0xe2   : > { %967 = vmatmul.f32.gmra.mxu3 %v470_v31 }
  0xe3   : > { %628 = vmatmul.f32.gmra.mxu0 %v469_v30  ;;  %v483_v30 = vld [vmem:[%s2150_s12 + $0x160] sm:$0xff] }
  0xe4   : > { %741 = vmatmul.f32.gmra.mxu1 %v470_v31  ;;  %v484_v31 = vld [vmem:[%s2150_s12 + $0x168] sm:$0xff] }
  0xe8   : > { %v584_v36 = vpop.f32.mrf.mxu0 }
  0xe9   : > { %857 = vmatmul.f32.gmra.mxu2 %v471_v32  ;;  %v697_v37 = vpop.f32.mrf.mxu1 }
  0xea   : > { %970 = vmatmul.f32.gmra.mxu3 %v472_v33  ;;  %v698_v38 = vadd.f32 %v697_v37, %v584_v36 }
  0xeb   : > { %631 = vmatmul.f32.gmra.mxu0 %v471_v32 }
  0xec   : > { %v810_v40 = vpop.f32.mrf.mxu2  ;;  %v1220_v42 = vadd.f32 %v2269_v35, %v698_v38  ;;  %744 = vmatmul.f32.gmra.mxu1 %v472_v33 }
  0xed   : > { %v923_v41 = vpop.f32.mrf.mxu3 }
  0xee   : > { %v924_v43 = vadd.f32 %v923_v41, %v810_v40  ;;  %1284 = vst [vmem:[%s2276_s15] sm:$0xff] %v1220_v42  ;;  %v485_v42 = vld [vmem:[%s2150_s12 + $0x170] sm:$0xff] }
  0xf0   : > { %v1221_v46 = vadd.f32 %v2271_v39, %v924_v43  ;;  %v587_v47 = vpop.f32.mrf.mxu0  ;;  %v486_v43 = vld [vmem:[%s2150_s12 + $0x178] sm:$0xff] }
  0xf1   : > { %860 = vmatmul.f32.gmra.mxu2 %v473_v44  ;;  %v700_v48 = vpop.f32.mrf.mxu1 }
  0xf2   : > { %1285 = vst [vmem:[%s2276_s15 + $0x8] sm:$0xff] %v1221_v46  ;;  %973 = vmatmul.f32.gmra.mxu3 %v474_v45  ;;  %v701_v49 = vadd.f32 %v700_v48, %v587_v47 }
  0xf3   : > { %634 = vmatmul.f32.gmra.mxu0 %v473_v44 }
  0xf4   : > { %v813_v50 = vpop.f32.mrf.mxu2  ;;  %v1222_v52 = vadd.f32 %v2269_v35, %v701_v49  ;;  %747 = vmatmul.f32.gmra.mxu1 %v474_v45 }
  0xf5   : > { %v926_v51 = vpop.f32.mrf.mxu3 }
  0xf6   : > { %v927_v53 = vadd.f32 %v926_v51, %v813_v50  ;;  %1286 = vst [vmem:[%s2276_s15 + $0x10] sm:$0xff] %v1222_v52  ;;  %v487_v52 = vld [vmem:[%s2150_s12 + $0x180] sm:$0xff] }
  0xf8   : > { %v1223_v56 = vadd.f32 %v2271_v39, %v927_v53  ;;  %v590_v57 = vpop.f32.mrf.mxu0  ;;  %v488_v53 = vld [vmem:[%s2150_s12 + $0x188] sm:$0xff] }
  0xf9   : > { %863 = vmatmul.f32.gmra.mxu2 %v475_v54  ;;  %v703_v58 = vpop.f32.mrf.mxu1 }
  0xfa   : > { %1287 = vst [vmem:[%s2276_s15 + $0x18] sm:$0xff] %v1223_v56  ;;  %976 = vmatmul.f32.gmra.mxu3 %v476_v55  ;;  %v704_v59 = vadd.f32 %v703_v58, %v590_v57 }
  0xfb   : > { %637 = vmatmul.f32.gmra.mxu0 %v475_v54 }
  0xfc   : > { %v816_v60 = vpop.f32.mrf.mxu2  ;;  %v1224_v62 = vadd.f32 %v2269_v35, %v704_v59  ;;  %750 = vmatmul.f32.gmra.mxu1 %v476_v55 }
  0xfd   : > { %v929_v61 = vpop.f32.mrf.mxu3 }
  0xfe   : > { %v930_v63 = vadd.f32 %v929_v61, %v816_v60  ;;  %1288 = vst [vmem:[%s2276_s15 + $0x20] sm:$0xff] %v1224_v62  ;;  %v489_v62 = vld [vmem:[%s2150_s12 + $0x190] sm:$0xff] }
 0x100   : > { %v1225_v2 = vadd.f32 %v2271_v39, %v930_v63  ;;  %v593_v3 = vpop.f32.mrf.mxu0  ;;  %v490_v63 = vld [vmem:[%s2150_s12 + $0x198] sm:$0xff] }
 0x101   : > { %866 = vmatmul.f32.gmra.mxu2 %v477_v0  ;;  %v706_v4 = vpop.f32.mrf.mxu1 }
 0x102   : > { %1289 = vst [vmem:[%s2276_s15 + $0x28] sm:$0xff] %v1225_v2  ;;  %979 = vmatmul.f32.gmra.mxu3 %v478_v1  ;;  %v707_v5 = vadd.f32 %v706_v4, %v593_v3 }
 0x103   : > { %640 = vmatmul.f32.gmra.mxu0 %v477_v0 }
 0x104   : > { %v819_v6 = vpop.f32.mrf.mxu2  ;;  %v1226_v8 = vadd.f32 %v2269_v35, %v707_v5  ;;  %753 = vmatmul.f32.gmra.mxu1 %v478_v1 }
 0x105   : > { %v932_v7 = vpop.f32.mrf.mxu3 }
 0x106   : > { %v933_v9 = vadd.f32 %v932_v7, %v819_v6  ;;  %1290 = vst [vmem:[%s2276_s15 + $0x30] sm:$0xff] %v1226_v8  ;;  %v491_v8 = vld [vmem:[%s2150_s12 + $0x1a0] sm:$0xff] }
 0x108   : > { %v1227_v12 = vadd.f32 %v2271_v39, %v933_v9  ;;  %v596_v13 = vpop.f32.mrf.mxu0  ;;  %v492_v9 = vld [vmem:[%s2150_s12 + $0x1a8] sm:$0xff] }
 0x109   : > { %869 = vmatmul.f32.gmra.mxu2 %v479_v10  ;;  %v709_v14 = vpop.f32.mrf.mxu1 }
 0x10a   : > { %1291 = vst [vmem:[%s2276_s15 + $0x38] sm:$0xff] %v1227_v12  ;;  %982 = vmatmul.f32.gmra.mxu3 %v480_v11  ;;  %v710_v15 = vadd.f32 %v709_v14, %v596_v13 }
 0x10b   : > { %643 = vmatmul.f32.gmra.mxu0 %v479_v10 }
 0x10c   : > { %v822_v16 = vpop.f32.mrf.mxu2  ;;  %v1228_v18 = vadd.f32 %v2269_v35, %v710_v15  ;;  %756 = vmatmul.f32.gmra.mxu1 %v480_v11 }
 0x10d   : > { %v935_v17 = vpop.f32.mrf.mxu3 }
 0x10e   : > { %v936_v19 = vadd.f32 %v935_v17, %v822_v16  ;;  %1292 = vst [vmem:[%s2276_s15 + $0x40] sm:$0xff] %v1228_v18  ;;  %v493_v18 = vld [vmem:[%s2150_s12 + $0x1b0] sm:$0xff] }
 0x110   : > { %v1229_v22 = vadd.f32 %v2271_v39, %v936_v19  ;;  %v599_v23 = vpop.f32.mrf.mxu0  ;;  %v494_v19 = vld [vmem:[%s2150_s12 + $0x1b8] sm:$0xff] }
 0x111   : > { %872 = vmatmul.f32.gmra.mxu2 %v481_v20  ;;  %v712_v24 = vpop.f32.mrf.mxu1 }
 0x112   : > { %1293 = vst [vmem:[%s2276_s15 + $0x48] sm:$0xff] %v1229_v22  ;;  %985 = vmatmul.f32.gmra.mxu3 %v482_v21  ;;  %v713_v25 = vadd.f32 %v712_v24, %v599_v23 }
 0x113   : > { %646 = vmatmul.f32.gmra.mxu0 %v481_v20 }
 0x114   : > { %v825_v26 = vpop.f32.mrf.mxu2  ;;  %v1230_v28 = vadd.f32 %v2269_v35, %v713_v25  ;;  %759 = vmatmul.f32.gmra.mxu1 %v482_v21 }
 0x115   : > { %v938_v27 = vpop.f32.mrf.mxu3 }
 0x116   : > { %v939_v29 = vadd.f32 %v938_v27, %v825_v26  ;;  %1294 = vst [vmem:[%s2276_s15 + $0x50] sm:$0xff] %v1230_v28  ;;  %v495_v28 = vld [vmem:[%s2150_s12 + $0x1c0] sm:$0xff] }
 0x118   : > { %v1231_v32 = vadd.f32 %v2271_v39, %v939_v29  ;;  %v602_v33 = vpop.f32.mrf.mxu0  ;;  %v496_v29 = vld [vmem:[%s2150_s12 + $0x1c8] sm:$0xff] }
 0x119   : > { %875 = vmatmul.f32.gmra.mxu2 %v483_v30  ;;  %v715_v34 = vpop.f32.mrf.mxu1 }
 0x11a   : > { %1295 = vst [vmem:[%s2276_s15 + $0x58] sm:$0xff] %v1231_v32  ;;  %988 = vmatmul.f32.gmra.mxu3 %v484_v31  ;;  %v716_v36 = vadd.f32 %v715_v34, %v602_v33 }
 0x11b   : > { %649 = vmatmul.f32.gmra.mxu0 %v483_v30 }
 0x11c   : > { %v828_v37 = vpop.f32.mrf.mxu2  ;;  %v1232_v40 = vadd.f32 %v2269_v35, %v716_v36  ;;  %762 = vmatmul.f32.gmra.mxu1 %v484_v31 }
 0x11d   : > { %v941_v38 = vpop.f32.mrf.mxu3 }
 0x11e   : > { %v942_v41 = vadd.f32 %v941_v38, %v828_v37  ;;  %1296 = vst [vmem:[%s2276_s15 + $0x60] sm:$0xff] %v1232_v40  ;;  %v497_v40 = vld [vmem:[%s2150_s12 + $0x1d0] sm:$0xff] }
 0x120   : > { %v1233_v44 = vadd.f32 %v2271_v39, %v942_v41  ;;  %v605_v45 = vpop.f32.mrf.mxu0  ;;  %v498_v41 = vld [vmem:[%s2150_s12 + $0x1d8] sm:$0xff] }
 0x121   : > { %878 = vmatmul.f32.gmra.mxu2 %v485_v42  ;;  %v718_v46 = vpop.f32.mrf.mxu1 }
 0x122   : > { %1297 = vst [vmem:[%s2276_s15 + $0x68] sm:$0xff] %v1233_v44  ;;  %991 = vmatmul.f32.gmra.mxu3 %v486_v43  ;;  %v719_v47 = vadd.f32 %v718_v46, %v605_v45 }
 0x123   : > { %652 = vmatmul.f32.gmra.mxu0 %v485_v42 }
 0x124   : > { %v831_v48 = vpop.f32.mrf.mxu2  ;;  %v1234_v50 = vadd.f32 %v2269_v35, %v719_v47  ;;  %765 = vmatmul.f32.gmra.mxu1 %v486_v43 }
 0x125   : > { %v944_v49 = vpop.f32.mrf.mxu3 }
 0x126   : > { %v945_v51 = vadd.f32 %v944_v49, %v831_v48  ;;  %1298 = vst [vmem:[%s2276_s15 + $0x70] sm:$0xff] %v1234_v50  ;;  %v499_v50 = vld [vmem:[%s2150_s12 + $0x1e0] sm:$0xff] }
 0x128   : > { %v1235_v54 = vadd.f32 %v2271_v39, %v945_v51  ;;  %v608_v55 = vpop.f32.mrf.mxu0  ;;  %v500_v51 = vld [vmem:[%s2150_s12 + $0x1e8] sm:$0xff] }
 0x129   : > { %881 = vmatmul.f32.gmra.mxu2 %v487_v52  ;;  %v721_v56 = vpop.f32.mrf.mxu1 }
 0x12a   : > { %1299 = vst [vmem:[%s2276_s15 + $0x78] sm:$0xff] %v1235_v54  ;;  %994 = vmatmul.f32.gmra.mxu3 %v488_v53  ;;  %v722_v57 = vadd.f32 %v721_v56, %v608_v55 }
 0x12b   : > { %655 = vmatmul.f32.gmra.mxu0 %v487_v52 }
 0x12c   : > { %v834_v58 = vpop.f32.mrf.mxu2  ;;  %v1236_v60 = vadd.f32 %v2269_v35, %v722_v57  ;;  %768 = vmatmul.f32.gmra.mxu1 %v488_v53 }
 0x12d   : > { %v947_v59 = vpop.f32.mrf.mxu3 }
 0x12e   : > { %v948_v61 = vadd.f32 %v947_v59, %v834_v58  ;;  %1300 = vst [vmem:[%s2276_s15 + $0x80] sm:$0xff] %v1236_v60  ;;  %v501_v60 = vld [vmem:[%s2150_s12 + $0x1f0] sm:$0xff] }
 0x130   : > { %v1237_v0 = vadd.f32 %v2271_v39, %v948_v61  ;;  %v611_v1 = vpop.f32.mrf.mxu0  ;;  %v502_v61 = vld [vmem:[%s2150_s12 + $0x1f8] sm:$0xff]  ;;  %s1366_s12 = sshll.u32 %s1363_s1, 4  ;;  %s1367_s12 = int_to_ptr.hbm [resolvable:$true] %s1366_s12 }
 0x131   : > { %884 = vmatmul.f32.gmra.mxu2 %v489_v62  ;;  %v724_v2 = vpop.f32.mrf.mxu1  ;;  %s1781_s20 = sshra.s32 %s1367_s12, 4  ;;  %s1782_s20 = int_to_ptr.hbm [resolvable:$true] %s1781_s20 }
 0x132   : > { %1301 = vst [vmem:[%s2276_s15 + $0x88] sm:$0xff] %v1237_v0  ;;  %997 = vmatmul.f32.gmra.mxu3 %v490_v63  ;;  %v725_v3 = vadd.f32 %v724_v2, %v611_v1  ;;  %s1783_s24 = scalar_lea.hbm %s1782_s20, 512  ;;  %p1788_p2 = scmp.lt.s32.totalorder %s1782_s20, %s2547_s11 }
 0x133   : > { %658 = vmatmul.f32.gmra.mxu0 %v489_v62  ;;  %p1784_p4 = scmp.ne.s32.totalorder %s1782_s20, %s1783_s24  ;;  %p1789_p1 = scmp.lt.s32.totalorder %s1787_s6, %s1783_s24 }
 0x134   : > { %v837_v4 = vpop.f32.mrf.mxu2  ;;  %v1238_v6 = vadd.f32 %v2269_v35, %v725_v3  ;;  %771 = vmatmul.f32.gmra.mxu1 %v490_v63 }
 0x135   : > { %v950_v5 = vpop.f32.mrf.mxu3  ;;  %p1785_p6 = pnand %p1784_p4, %p2116_p3  ;;  %p1790_p7 = por %p1789_p1, %p1788_p2 }
 0x136   : > { %v951_v7 = vadd.f32 %v950_v5, %v837_v4  ;;  %1302 = vst [vmem:[%s2276_s15 + $0x90] sm:$0xff] %v1238_v6 }
 0x137   : > { %p1786_p9 = pneg %p1785_p6 }
 0x138   : > { %v1239_v10 = vadd.f32 %v2271_v39, %v951_v7  ;;  %v614_v11 = vpop.f32.mrf.mxu0 }
 0x139   : > { %887 = vmatmul.f32.gmra.mxu2 %v491_v8  ;;  %v727_v12 = vpop.f32.mrf.mxu1  ;;  %p1791_p8 = pnand %p1790_p7, %p1786_p9 }
 0x13a   : > { %1303 = vst [vmem:[%s2276_s15 + $0x98] sm:$0xff] %v1239_v10  ;;  %1000 = vmatmul.f32.gmra.mxu3 %v492_v9  ;;  %v728_v13 = vadd.f32 %v727_v12, %v614_v11 }
 0x13b   : > { %661 = vmatmul.f32.gmra.mxu0 %v491_v8 }
 0x13c   : > { %v840_v14 = vpop.f32.mrf.mxu2  ;;  %v1240_v16 = vadd.f32 %v2269_v35, %v728_v13  ;;  %774 = vmatmul.f32.gmra.mxu1 %v492_v9 }
 0x13d   : > { %v953_v15 = vpop.f32.mrf.mxu3 }
 0x13e   : > { %v954_v17 = vadd.f32 %v953_v15, %v840_v14  ;;  %1304 = vst [vmem:[%s2276_s15 + $0xa0] sm:$0xff] %v1240_v16 }
 0x140   : > { %v1241_v20 = vadd.f32 %v2271_v39, %v954_v17  ;;  %v617_v21 = vpop.f32.mrf.mxu0 }
 0x141   : > { %890 = vmatmul.f32.gmra.mxu2 %v493_v18  ;;  %v730_v22 = vpop.f32.mrf.mxu1 }
 0x142   : > { %1305 = vst [vmem:[%s2276_s15 + $0xa8] sm:$0xff] %v1241_v20  ;;  %1003 = vmatmul.f32.gmra.mxu3 %v494_v19  ;;  %v731_v23 = vadd.f32 %v730_v22, %v617_v21 }
 0x143   : > { %664 = vmatmul.f32.gmra.mxu0 %v493_v18 }
 0x144   : > { %v843_v24 = vpop.f32.mrf.mxu2  ;;  %v1242_v26 = vadd.f32 %v2269_v35, %v731_v23  ;;  %777 = vmatmul.f32.gmra.mxu1 %v494_v19 }
 0x145   : > { %v956_v25 = vpop.f32.mrf.mxu3 }
 0x146   : > { %v957_v27 = vadd.f32 %v956_v25, %v843_v24  ;;  %1306 = vst [vmem:[%s2276_s15 + $0xb0] sm:$0xff] %v1242_v26 }
 0x148   : > { %v1243_v30 = vadd.f32 %v2271_v39, %v957_v27  ;;  %v620_v31 = vpop.f32.mrf.mxu0 }
 0x149   : > { %893 = vmatmul.f32.gmra.mxu2 %v495_v28  ;;  %v733_v32 = vpop.f32.mrf.mxu1 }
 0x14a   : > { %1307 = vst [vmem:[%s2276_s15 + $0xb8] sm:$0xff] %v1243_v30  ;;  %1006 = vmatmul.f32.gmra.mxu3 %v496_v29  ;;  %v734_v33 = vadd.f32 %v733_v32, %v620_v31 }
 0x14b   : > { %667 = vmatmul.f32.gmra.mxu0 %v495_v28 }
 0x14c   : > { %v846_v34 = vpop.f32.mrf.mxu2  ;;  %v1244_v37 = vadd.f32 %v2269_v35, %v734_v33  ;;  %780 = vmatmul.f32.gmra.mxu1 %v496_v29 }
 0x14d   : > { %v959_v36 = vpop.f32.mrf.mxu3 }
 0x14e   : > { %v960_v38 = vadd.f32 %v959_v36, %v846_v34  ;;  %1308 = vst [vmem:[%s2276_s15 + $0xc0] sm:$0xff] %v1244_v37 }
 0x150   : > { %v1245_v42 = vadd.f32 %v2271_v39, %v960_v38  ;;  %v623_v43 = vpop.f32.mrf.mxu0 }
 0x151   : > { %896 = vmatmul.f32.gmra.mxu2 %v497_v40  ;;  %v736_v44 = vpop.f32.mrf.mxu1 }
 0x152   : > { %1309 = vst [vmem:[%s2276_s15 + $0xc8] sm:$0xff] %v1245_v42  ;;  %1009 = vmatmul.f32.gmra.mxu3 %v498_v41  ;;  %v737_v45 = vadd.f32 %v736_v44, %v623_v43 }
 0x153   : > { %670 = vmatmul.f32.gmra.mxu0 %v497_v40 }
 0x154   : > { %v849_v46 = vpop.f32.mrf.mxu2  ;;  %v1246_v48 = vadd.f32 %v2269_v35, %v737_v45  ;;  %783 = vmatmul.f32.gmra.mxu1 %v498_v41 }
 0x155   : > { %v962_v47 = vpop.f32.mrf.mxu3 }
 0x156   : > { %v963_v49 = vadd.f32 %v962_v47, %v849_v46  ;;  %1310 = vst [vmem:[%s2276_s15 + $0xd0] sm:$0xff] %v1246_v48 }
 0x158   : > { %v1247_v52 = vadd.f32 %v2271_v39, %v963_v49  ;;  %v626_v53 = vpop.f32.mrf.mxu0 }
 0x159   : > { %899 = vmatmul.f32.gmra.mxu2 %v499_v50  ;;  %v739_v54 = vpop.f32.mrf.mxu1 }
 0x15a   : > { %1311 = vst [vmem:[%s2276_s15 + $0xd8] sm:$0xff] %v1247_v52  ;;  %1012 = vmatmul.f32.gmra.mxu3 %v500_v51  ;;  %v740_v55 = vadd.f32 %v739_v54, %v626_v53 }
 0x15b   : > { %673 = vmatmul.f32.gmra.mxu0 %v499_v50 }
 0x15c   : > { %v852_v56 = vpop.f32.mrf.mxu2  ;;  %v1248_v58 = vadd.f32 %v2269_v35, %v740_v55  ;;  %786 = vmatmul.f32.gmra.mxu1 %v500_v51 }
 0x15d   : > { %v965_v57 = vpop.f32.mrf.mxu3 }
 0x15e   : > { %v966_v59 = vadd.f32 %v965_v57, %v852_v56  ;;  %1312 = vst [vmem:[%s2276_s15 + $0xe0] sm:$0xff] %v1248_v58 }
 0x160   : > { %v1249_v62 = vadd.f32 %v2271_v39, %v966_v59  ;;  %v629_v63 = vpop.f32.mrf.mxu0 }
 0x161   : > { %902 = vmatmul.f32.gmra.mxu2 %v501_v60  ;;  %v742_v0 = vpop.f32.mrf.mxu1 }
 0x162   : > { %1313 = vst [vmem:[%s2276_s15 + $0xe8] sm:$0xff] %v1249_v62  ;;  %1015 = vmatmul.f32.gmra.mxu3 %v502_v61  ;;  %v743_v1 = vadd.f32 %v742_v0, %v629_v63 }
 0x163   : > { %676 = vmatmul.f32.gmra.mxu0 %v501_v60 }
 0x164   : > { %v855_v2 = vpop.f32.mrf.mxu2  ;;  %v1250_v4 = vadd.f32 %v2269_v35, %v743_v1  ;;  %789 = vmatmul.f32.gmra.mxu1 %v502_v61 }
 0x165   : > { %v968_v3 = vpop.f32.mrf.mxu3 }
 0x166   : > { %v969_v5 = vadd.f32 %v968_v3, %v855_v2  ;;  %1314 = vst [vmem:[%s2276_s15 + $0xf0] sm:$0xff] %v1250_v4 }
 0x168   : > { %v1251_v6 = vadd.f32 %v2271_v39, %v969_v5  ;;  %v632_v7 = vpop.f32.mrf.mxu0 }
 0x169   : > { %v745_v8 = vpop.f32.mrf.mxu1 }
 0x16a   : > { %1315 = vst [vmem:[%s2276_s15 + $0xf8] sm:$0xff] %v1251_v6  ;;  %v746_v9 = vadd.f32 %v745_v8, %v632_v7 }
 0x16c   : > { %v858_v10 = vpop.f32.mrf.mxu2  ;;  %v1252_v12 = vadd.f32 %v2269_v35, %v746_v9 }
 0x16d   : > { %v971_v11 = vpop.f32.mrf.mxu3 }
 0x16e   : > { %v972_v13 = vadd.f32 %v971_v11, %v858_v10  ;;  %1316 = vst [vmem:[%s2276_s15 + $0x100] sm:$0xff] %v1252_v12 }
 0x170   : > { %v1253_v14 = vadd.f32 %v2271_v39, %v972_v13  ;;  %v635_v15 = vpop.f32.mrf.mxu0 }
 0x171   : > { %v748_v16 = vpop.f32.mrf.mxu1 }
 0x172   : > { %1317 = vst [vmem:[%s2276_s15 + $0x108] sm:$0xff] %v1253_v14  ;;  %v749_v17 = vadd.f32 %v748_v16, %v635_v15 }
 0x174   : > { %v861_v18 = vpop.f32.mrf.mxu2  ;;  %v1254_v20 = vadd.f32 %v2269_v35, %v749_v17 }
 0x175   : > { %v974_v19 = vpop.f32.mrf.mxu3 }
 0x176   : > { %v975_v21 = vadd.f32 %v974_v19, %v861_v18  ;;  %1318 = vst [vmem:[%s2276_s15 + $0x110] sm:$0xff] %v1254_v20 }
 0x178   : > { %v1255_v22 = vadd.f32 %v2271_v39, %v975_v21  ;;  %v638_v23 = vpop.f32.mrf.mxu0 }
 0x179   : > { %v751_v24 = vpop.f32.mrf.mxu1 }
 0x17a   : > { %1319 = vst [vmem:[%s2276_s15 + $0x118] sm:$0xff] %v1255_v22  ;;  %v752_v25 = vadd.f32 %v751_v24, %v638_v23 }
 0x17c   : > { %v864_v26 = vpop.f32.mrf.mxu2  ;;  %v1256_v28 = vadd.f32 %v2269_v35, %v752_v25 }
 0x17d   : > { %v977_v27 = vpop.f32.mrf.mxu3 }
 0x17e   : > { %v978_v29 = vadd.f32 %v977_v27, %v864_v26  ;;  %1320 = vst [vmem:[%s2276_s15 + $0x120] sm:$0xff] %v1256_v28 }
 0x180   : > { %v1257_v30 = vadd.f32 %v2271_v39, %v978_v29  ;;  %v641_v31 = vpop.f32.mrf.mxu0 }
 0x181   : > { %v754_v32 = vpop.f32.mrf.mxu1 }
 0x182   : > { %1321 = vst [vmem:[%s2276_s15 + $0x128] sm:$0xff] %v1257_v30  ;;  %v755_v33 = vadd.f32 %v754_v32, %v641_v31 }
 0x184   : > { %v867_v34 = vpop.f32.mrf.mxu2  ;;  %v1258_v37 = vadd.f32 %v2269_v35, %v755_v33 }
 0x185   : > { %v980_v36 = vpop.f32.mrf.mxu3 }
 0x186   : > { %v981_v38 = vadd.f32 %v980_v36, %v867_v34  ;;  %1322 = vst [vmem:[%s2276_s15 + $0x130] sm:$0xff] %v1258_v37 }
 0x188   : > { %v1259_v40 = vadd.f32 %v2271_v39, %v981_v38  ;;  %v644_v41 = vpop.f32.mrf.mxu0 }
 0x189   : > { %v757_v42 = vpop.f32.mrf.mxu1 }
 0x18a   : > { %1323 = vst [vmem:[%s2276_s15 + $0x138] sm:$0xff] %v1259_v40  ;;  %v758_v43 = vadd.f32 %v757_v42, %v644_v41 }
 0x18c   : > { %v870_v44 = vpop.f32.mrf.mxu2  ;;  %v1260_v46 = vadd.f32 %v2269_v35, %v758_v43 }
 0x18d   : > { %v983_v45 = vpop.f32.mrf.mxu3 }
 0x18e   : > { %v984_v47 = vadd.f32 %v983_v45, %v870_v44  ;;  %1324 = vst [vmem:[%s2276_s15 + $0x140] sm:$0xff] %v1260_v46 }
 0x190   : > { %v1261_v48 = vadd.f32 %v2271_v39, %v984_v47  ;;  %v647_v49 = vpop.f32.mrf.mxu0 }
 0x191   : > { %v760_v50 = vpop.f32.mrf.mxu1 }
 0x192   : > { %1325 = vst [vmem:[%s2276_s15 + $0x148] sm:$0xff] %v1261_v48  ;;  %v761_v51 = vadd.f32 %v760_v50, %v647_v49 }
 0x194   : > { %v873_v52 = vpop.f32.mrf.mxu2  ;;  %v1262_v54 = vadd.f32 %v2269_v35, %v761_v51 }
 0x195   : > { %v986_v53 = vpop.f32.mrf.mxu3 }
 0x196   : > { %v987_v55 = vadd.f32 %v986_v53, %v873_v52  ;;  %1326 = vst [vmem:[%s2276_s15 + $0x150] sm:$0xff] %v1262_v54 }
 0x198   : > { %v1263_v56 = vadd.f32 %v2271_v39, %v987_v55  ;;  %v650_v57 = vpop.f32.mrf.mxu0 }
 0x199   : > { %v763_v58 = vpop.f32.mrf.mxu1 }
 0x19a   : > { %1327 = vst [vmem:[%s2276_s15 + $0x158] sm:$0xff] %v1263_v56  ;;  %v764_v59 = vadd.f32 %v763_v58, %v650_v57 }
 0x19c   : > { %v876_v60 = vpop.f32.mrf.mxu2  ;;  %v1264_v62 = vadd.f32 %v2269_v35, %v764_v59 }
 0x19d   : > { %v989_v61 = vpop.f32.mrf.mxu3 }
 0x19e   : > { %v990_v63 = vadd.f32 %v989_v61, %v876_v60  ;;  %1328 = vst [vmem:[%s2276_s15 + $0x160] sm:$0xff] %v1264_v62 }
 0x1a0   : > { %v1265_v0 = vadd.f32 %v2271_v39, %v990_v63  ;;  %v653_v1 = vpop.f32.mrf.mxu0 }
 0x1a1   : > { %v766_v2 = vpop.f32.mrf.mxu1 }
 0x1a2   : > { %1329 = vst [vmem:[%s2276_s15 + $0x168] sm:$0xff] %v1265_v0  ;;  %v767_v3 = vadd.f32 %v766_v2, %v653_v1 }
 0x1a4   : > { %v879_v4 = vpop.f32.mrf.mxu2  ;;  %v1266_v6 = vadd.f32 %v2269_v35, %v767_v3 }
 0x1a5   : > { %v992_v5 = vpop.f32.mrf.mxu3 }
 0x1a6   : > { %v993_v7 = vadd.f32 %v992_v5, %v879_v4  ;;  %1330 = vst [vmem:[%s2276_s15 + $0x170] sm:$0xff] %v1266_v6 }
 0x1a8   : > { %v1267_v8 = vadd.f32 %v2271_v39, %v993_v7  ;;  %v656_v9 = vpop.f32.mrf.mxu0 }
 0x1a9   : > { %v769_v10 = vpop.f32.mrf.mxu1 }
 0x1aa   : > { %1331 = vst [vmem:[%s2276_s15 + $0x178] sm:$0xff] %v1267_v8  ;;  %v770_v11 = vadd.f32 %v769_v10, %v656_v9 }
 0x1ac   : > { %v882_v12 = vpop.f32.mrf.mxu2  ;;  %v1268_v14 = vadd.f32 %v2269_v35, %v770_v11 }
 0x1ad   : > { %v995_v13 = vpop.f32.mrf.mxu3 }
 0x1ae   : > { %v996_v15 = vadd.f32 %v995_v13, %v882_v12  ;;  %1332 = vst [vmem:[%s2276_s15 + $0x180] sm:$0xff] %v1268_v14 }
 0x1b0   : > { %v1269_v16 = vadd.f32 %v2271_v39, %v996_v15  ;;  %v659_v17 = vpop.f32.mrf.mxu0 }
 0x1b1   : > { %v772_v18 = vpop.f32.mrf.mxu1 }
 0x1b2   : > { %1333 = vst [vmem:[%s2276_s15 + $0x188] sm:$0xff] %v1269_v16  ;;  %v773_v19 = vadd.f32 %v772_v18, %v659_v17 }
 0x1b4   : > { %v885_v20 = vpop.f32.mrf.mxu2  ;;  %v1270_v22 = vadd.f32 %v2269_v35, %v773_v19 }
 0x1b5   : > { %v998_v21 = vpop.f32.mrf.mxu3 }
 0x1b6   : > { %v999_v23 = vadd.f32 %v998_v21, %v885_v20  ;;  %1334 = vst [vmem:[%s2276_s15 + $0x190] sm:$0xff] %v1270_v22 }
 0x1b8   : > { %v1271_v24 = vadd.f32 %v2271_v39, %v999_v23  ;;  %v662_v25 = vpop.f32.mrf.mxu0 }
 0x1b9   : > { %v775_v26 = vpop.f32.mrf.mxu1 }
 0x1ba   : > { %1335 = vst [vmem:[%s2276_s15 + $0x198] sm:$0xff] %v1271_v24  ;;  %v776_v27 = vadd.f32 %v775_v26, %v662_v25 }
 0x1bc   : > { %v888_v28 = vpop.f32.mrf.mxu2  ;;  %v1272_v30 = vadd.f32 %v2269_v35, %v776_v27 }
 0x1bd   : > { %v1001_v29 = vpop.f32.mrf.mxu3 }
 0x1be   : > { %v1002_v31 = vadd.f32 %v1001_v29, %v888_v28  ;;  %1336 = vst [vmem:[%s2276_s15 + $0x1a0] sm:$0xff] %v1272_v30 }
 0x1c0   : > { %v1273_v32 = vadd.f32 %v2271_v39, %v1002_v31  ;;  %v665_v33 = vpop.f32.mrf.mxu0 }
 0x1c1   : > { %v778_v34 = vpop.f32.mrf.mxu1 }
 0x1c2   : > { %1337 = vst [vmem:[%s2276_s15 + $0x1a8] sm:$0xff] %v1273_v32  ;;  %v779_v36 = vadd.f32 %v778_v34, %v665_v33 }
 0x1c4   : > { %v891_v37 = vpop.f32.mrf.mxu2  ;;  %v1274_v40 = vadd.f32 %v2269_v35, %v779_v36 }
 0x1c5   : > { %v1004_v38 = vpop.f32.mrf.mxu3 }
 0x1c6   : > { %v1005_v41 = vadd.f32 %v1004_v38, %v891_v37  ;;  %1338 = vst [vmem:[%s2276_s15 + $0x1b0] sm:$0xff] %v1274_v40 }
 0x1c8   : > { %v1275_v42 = vadd.f32 %v2271_v39, %v1005_v41  ;;  %v668_v43 = vpop.f32.mrf.mxu0 }
 0x1c9   : > { %v781_v44 = vpop.f32.mrf.mxu1 }
 0x1ca   : > { %1339 = vst [vmem:[%s2276_s15 + $0x1b8] sm:$0xff] %v1275_v42  ;;  %v782_v45 = vadd.f32 %v781_v44, %v668_v43 }
 0x1cc   : > { %v894_v46 = vpop.f32.mrf.mxu2  ;;  %v1276_v48 = vadd.f32 %v2269_v35, %v782_v45 }
 0x1cd   : > { %v1007_v47 = vpop.f32.mrf.mxu3 }
 0x1ce   : > { %v1008_v49 = vadd.f32 %v1007_v47, %v894_v46  ;;  %1340 = vst [vmem:[%s2276_s15 + $0x1c0] sm:$0xff] %v1276_v48 }
 0x1d0   : > { %v1277_v50 = vadd.f32 %v2271_v39, %v1008_v49  ;;  %v671_v51 = vpop.f32.mrf.mxu0 }
 0x1d1   : > { %v784_v52 = vpop.f32.mrf.mxu1 }
 0x1d2   : > { %1341 = vst [vmem:[%s2276_s15 + $0x1c8] sm:$0xff] %v1277_v50  ;;  %v785_v53 = vadd.f32 %v784_v52, %v671_v51 }
 0x1d4   : > { %v897_v54 = vpop.f32.mrf.mxu2  ;;  %v1278_v56 = vadd.f32 %v2269_v35, %v785_v53 }
 0x1d5   : > { %v1010_v55 = vpop.f32.mrf.mxu3 }
 0x1d6   : > { %v1011_v57 = vadd.f32 %v1010_v55, %v897_v54  ;;  %1342 = vst [vmem:[%s2276_s15 + $0x1d0] sm:$0xff] %v1278_v56 }
 0x1d8   : > { %v1279_v58 = vadd.f32 %v2271_v39, %v1011_v57  ;;  %v674_v59 = vpop.f32.mrf.mxu0 }
 0x1d9   : > { %v787_v60 = vpop.f32.mrf.mxu1 }
 0x1da   : > { %1343 = vst [vmem:[%s2276_s15 + $0x1d8] sm:$0xff] %v1279_v58  ;;  %v788_v61 = vadd.f32 %v787_v60, %v674_v59 }
 0x1dc   : > { %v900_v62 = vpop.f32.mrf.mxu2  ;;  %v1280_v0 = vadd.f32 %v2269_v35, %v788_v61 }
 0x1dd   : > { %v1013_v63 = vpop.f32.mrf.mxu3 }
 0x1de   : > { %v1014_v1 = vadd.f32 %v1013_v63, %v900_v62  ;;  %1344 = vst [vmem:[%s2276_s15 + $0x1e0] sm:$0xff] %v1280_v0 }
 0x1e0   : > { %v1281_v2 = vadd.f32 %v2271_v39, %v1014_v1  ;;  %v677_v3 = vpop.f32.mrf.mxu0 }
 0x1e1   : > { %v790_v4 = vpop.f32.mrf.mxu1 }
 0x1e2   : > { %1345 = vst [vmem:[%s2276_s15 + $0x1e8] sm:$0xff] %v1281_v2  ;;  %v791_v5 = vadd.f32 %v790_v4, %v677_v3 }
 0x1e4   : > { %v903_v6 = vpop.f32.mrf.mxu2  ;;  %v1282_v8 = vadd.f32 %v2269_v35, %v791_v5 }
 0x1e5   : > { %v1016_v7 = vpop.f32.mrf.mxu3 }
 0x1e6   : > { %v1017_v9 = vadd.f32 %v1016_v7, %v903_v6  ;;  %1346 = vst [vmem:[%s2276_s15 + $0x1f0] sm:$0xff] %v1282_v8 }
 0x1e8   : > { %v1283_v10 = vadd.f32 %v2271_v39, %v1017_v9 }
 0x1ea   : > { %1347 = vst [vmem:[%s2276_s15 + $0x1f8] sm:$0xff] %v1283_v10 }
 0x1eb   : > { %1794 = shalt.err (!%p1791_p8)
}
 0x1ec   : > { %s1922_s8 = smov 256   ;;  %s1923_s15 = smov 768  }
 0x1ed   : > { %s1924_s9 = smov 16  }
 0x1ee   : > { %1541 = dma.vmem_to_hbm [thread:$0]  (%p2116_p3), %s1365_s3, 8192, %s1367_s12, %s1349_s14, %s1922_s8, %s1923_s15, %s1924_s9  }
 0x1ef PF: > { %s2548_s29 = sld [smem:[#allocation13_spill]]  ;;  %p1558_p10 = scmp.ge.s32.totalorder %s1917_s25, 2 }
 0x1f1   : > { %p1554_p11 = pnand %p1558_p10, %p2123_p5 }
 0x1f3   : > { %p1555_p12 = pneg %p1554_p11 }
 0x1f5   : > { %s1381_s18 = sand.u32 1, %s2548_s29  }
 0x1f6   : > { %s1382_s22 = scalar_lea.sflag [#allocation5], %s1381_s18 }
 0x1f7   : > { %1860 = dma.done.wait (%p1555_p12), %s1382_s22, 8192  }
 0x1f8   : > { %1862 = vsyncadd (%p1555_p12), %s1382_s22, 4294959104  ;;  %s22_s25 = sadd.s32 1, %s1917_s25   ;;  %s2551_s28 = sld [smem:[#allocation14_spill]] }
 0x1f9   : > { %p2456_p13 = scmp.ge.s32.totalorder %s22_s25, 8   ;;  %s2552_s14 = sld [smem:[#allocation23_spill]] }
 0x1fa   : > { %s2553_s7 = sld [smem:[#allocation21_spill]]  ;;  %s2559_s12 = smov %s1869_s13 }
 0x1fb   : > { %s2554_s21 = sld [smem:[#allocation15_spill]]  ;;  %s2561_s15 = smov %s1881_s16 }
 0x1fc   : > { %s2555_s20 = sld [smem:[#allocation22_spill]]  ;;  %s2562_s16 = smov %s1885_s17 }
 0x1fd   : > { %s2556_s22 = sld [smem:[#allocation18_spill]]  ;;  %s2564_s18 = smov %s1893_s19 }
 0x1fe   : > { %s2557_s1 = sld [smem:[#allocation19_spill]]  ;;  %s2560_s13 = smov %s2551_s28 }
 0x1ff   : > { %s2558_s24 = sld [smem:[#allocation20_spill]] }
 0x200   : > { %s2563_s17 = smov %s2553_s7  ;;  %21 = sbr.rel (!%p2456_p13) target bundleno = 15 (0xf), region = 109 }
 0x201   : > { %s2565_s19 = smov %s2554_s21  ;;  %s2566_s21 = smov %s1909_s23 }
 0x204   : > { %s2567_s23 = smov %s2557_s1 }
 0x205   :  { %1388 = vsyncpa [#allocation4], 1 }
 0x206   :  { %1390 = vsyncpa [#allocation4 + $0x1], 1 }
 0x207   :  { %1391 = vsyncpa [#allocation7], 1 }
 0x208   :  { %1393 = vsyncpa [#allocation7 + $0x1], 1 }
 0x209   :  { %1394 = vsyncpa [#allocation5], 1 }
 0x20a   :  { %1396 = vsyncpa [#allocation5 + $0x1], 1 }

</bundles_post_ra>
